<compile_context>
chip_gen: v7x
topology: tpu7x:2x2x1
jax: 0.10.0
libtpu: 0.0.40
codegen_flags: <defaults>
</compile_context>

<pallas_src>
import jax
import jax.numpy as jnp
from jax import lax
from jax.experimental import pallas as pl
from jax.experimental.pallas import tpu as pltpu


def _round_up(x, m):
    return ((x + m - 1) // m) * m


def _pick_tile(dim, tile):
    """Return (padded_dim, tile): tile is a multiple of 128 dividing padded_dim."""
    tile = max(128, _round_up(tile, 128))
    dim_pad = _round_up(dim, 128)
    if dim_pad <= tile:
        return dim_pad, dim_pad
    return _round_up(dim, tile), tile


def _chamfer_kernel(src_ref, tgt_ref, src_min_ref, tgt_min_ref):
    # src_ref:     (1, TN, K)  augmented source points (K = C + 2)
    # tgt_ref:     (1, K, TM)  augmented target points, channels-first
    # src_min_ref: (1, TN, 1)  running row-min, resident across the M axis
    # tgt_min_ref: (1, MB, TM) running col-min, resident across N and M axes
    n_idx = pl.program_id(1)
    m_idx = pl.program_id(2)

    lhs = src_ref[0]    # (TN, K)
    rhs = tgt_ref[0]    # (K, TM)

    # Entire squared-distance tile comes out of a single MXU matmul.
    d = lax.dot_general(lhs, rhs, (((1,), (0,)), ((), ())),
                        preferred_element_type=jnp.float32)   # (TN, TM)

    row_min = jnp.min(d, axis=1, keepdims=True)   # (TN, 1): nearest tgt per src
    col_min = jnp.min(d, axis=0, keepdims=True)   # (1, TM): nearest src per tgt

    # --- src-side running min (reduction over the innermost M axis) ---
    @pl.when(m_idx == 0)
    def _():
        src_min_ref[...] = row_min[None]

    @pl.when(m_idx > 0)
    def _():
        src_min_ref[...] = jnp.minimum(src_min_ref[...], row_min[None])

    # --- tgt-side running min (reduction over the N axis) ---
    # One lane-dense sublane row of the resident (1, MB, TM) block per M tile.
    @pl.when(n_idx == 0)
    def _():
        tgt_min_ref[:, pl.ds(m_idx, 1), :] = col_min[None]

    @pl.when(n_idx > 0)
    def _():
        cur = tgt_min_ref[:, pl.ds(m_idx, 1), :]
        tgt_min_ref[:, pl.ds(m_idx, 1), :] = jnp.minimum(cur, col_min[None])


def chamfer_distance_loss(src_points, tgt_points, *, squared=False,
                          reduction="mean", eps=1e-12, inf=1e10,
                          tile_n=1024, tile_m=1024):
    """Chamfer distance between (B, N, C) and (B, M, C) point clouds."""
    assert reduction in ("mean", "sum")
    B, N, C = src_points.shape
    B2, M, C2 = tgt_points.shape
    assert B == B2 and C == C2
    K = C + 2

    src = src_points.astype(jnp.float32)
    tgt = tgt_points.astype(jnp.float32)

    # Tile sizes: 1024 keeps the (TN, TM) f32 tile at 4 MiB (safe for v7x's
    # 64 MiB VMEM); on v5e/v6e (128 MiB) tile_n/tile_m can be raised to 2048.
    N_pad, TN = _pick_tile(N, tile_n)
    M_pad, TM = _pick_tile(M, tile_m)
    MB = M_pad // TM

    # Augmented operands: src_aug @ tgt_aug == |s|^2 - 2 s.t + |t|^2.
    src_aug = jnp.concatenate(
        [-2.0 * src,
         jnp.sum(src * src, axis=-1, keepdims=True),
         jnp.ones((B, N, 1), jnp.float32)], axis=-1)          # (B, N, K)
    tgt_aug = jnp.concatenate(
        [jnp.swapaxes(tgt, 1, 2),
         jnp.ones((B, 1, M), jnp.float32),
         jnp.sum(tgt * tgt, axis=-1)[:, None, :]], axis=1)    # (B, K, M)

    # Pad N / M with "points at infinity" so partial tiles never win a min.
    if N_pad > N:
        pad = jnp.zeros((B, N_pad - N, K), jnp.float32)
        pad = pad.at[:, :, C].set(inf)        # |s|^2 slot
        pad = pad.at[:, :, C + 1].set(1.0)    # ones slot
        src_aug = jnp.concatenate([src_aug, pad], axis=1)
    if M_pad > M:
        pad = jnp.zeros((B, K, M_pad - M), jnp.float32)
        pad = pad.at[:, C, :].set(1.0)        # ones slot
        pad = pad.at[:, C + 1, :].set(inf)    # |t|^2 slot
        tgt_aug = jnp.concatenate([tgt_aug, pad], axis=2)

    grid = (B, N_pad // TN, M_pad // TM)

    src_min, tgt_min = pl.pallas_call(
        _chamfer_kernel,
        out_shape=(
            jax.ShapeDtypeStruct((B, N_pad, 1), jnp.float32),
            jax.ShapeDtypeStruct((B, MB, TM), jnp.float32),
        ),
        grid_spec=pltpu.PrefetchScalarGridSpec(
            num_scalar_prefetch=0,
            grid=grid,
            in_specs=[
                pl.BlockSpec((1, TN, K), lambda b, n, m: (b, n, 0)),
                pl.BlockSpec((1, K, TM), lambda b, n, m: (b, 0, m)),
            ],
            out_specs=[
                pl.BlockSpec((1, TN, 1), lambda b, n, m: (b, n, 0)),
                pl.BlockSpec((1, MB, TM), lambda b, n, m: (b, 0, 0)),
            ],
        ),
        compiler_params=pltpu.CompilerParams(
            dimension_semantics=("parallel", "arbitrary", "arbitrary"),
            vmem_limit_bytes=32 * 1024 * 1024,
        ),
    )(src_aug, tgt_aug)

    # Only the N + M minima see the clamp / sqrt / eps (clamp and sqrt are
    # monotone, so this is bit-for-bit the reference semantics).
    src_nn = jnp.maximum(src_min[:, :N, 0], 0.0)                  # (B, N)
    tgt_nn = jnp.maximum(tgt_min.reshape(B, M_pad)[:, :M], 0.0)   # (B, M)
    if not squared:
        src_nn = jnp.sqrt(src_nn + eps)
        tgt_nn = jnp.sqrt(tgt_nn + eps)

    red = jnp.mean if reduction == "mean" else jnp.sum
    return red(src_nn) + red(tgt_nn)


class ChamferDistanceLoss:
    """Mirror of the PyTorch module (no learnable parameters)."""

    def __init__(self, squared=False, truncate=None, reduction="mean",
                 eps=1e-12, inf=1e10):
        assert reduction in ("mean", "sum")
        # TODO(synk): `truncate` is not implemented in the Pallas path.
        assert truncate is None
        self.squared = squared
        self.reduction = reduction
        self.eps = eps
        self.inf = inf

    def __call__(self, src_points, tgt_points, src_masks=None, tgt_masks=None,
                 tile_n=1024, tile_m=1024):
        # TODO(synk): src_masks / tgt_masks not implemented (forward defaults to None).
        assert src_masks is None and tgt_masks is None
        return chamfer_distance_loss(
            src_points, tgt_points, squared=self.squared,
            reduction=self.reduction, eps=self.eps, inf=self.inf,
            tile_n=tile_n, tile_m=tile_m)


def _reference(src, tgt, squared=False, eps=1e-12, reduction="mean"):
    # Pure-JAX reference of the PyTorch semantics (masks / truncate = None).
    diff = src[:, :, None, :] - tgt[:, None, :, :]
    d = jnp.maximum(jnp.sum(diff * diff, axis=-1), 0.0)
    if not squared:
        d = jnp.sqrt(d + eps)
    red = jnp.mean if reduction == "mean" else jnp.sum
    return red(jnp.min(d, axis=-1)) + red(jnp.min(d, axis=-2))


if __name__ == "__main__":
    key = jax.random.PRNGKey(0)
    k1, k2 = jax.random.split(key)
    B, N, M, C = 2, 192, 160, 3
    src = jax.random.normal(k1, (B, N, C), dtype=jnp.float32)
    tgt = jax.random.normal(k2, (B, M, C), dtype=jnp.float32)

    # Small tiles so both the multi-tile accumulation paths (n > 0 / m > 0)
    # and the padding path (192 -> 256, 160 -> 256) are exercised.
    loss = jax.block_until_ready(
        chamfer_distance_loss(src, tgt, squared=False, reduction="mean",
                              tile_n=128, tile_m=128))
    ref = jax.block_until_ready(_reference(src, tgt, squared=False,
                                           reduction="mean"))
    assert jnp.allclose(loss, ref, atol=1e-4, rtol=1e-3), (loss, ref)

    # Squared / sum variant through the module-style wrapper (default tiles:
    # single tile per batch element).
    loss_fn = ChamferDistanceLoss(squared=True, reduction="sum")
    loss2 = jax.block_until_ready(loss_fn(src, tgt))
    ref2 = jax.block_until_ready(_reference(src, tgt, squared=True,
                                            reduction="sum"))
    assert jnp.allclose(loss2, ref2, atol=1e-2, rtol=1e-3), (loss2, ref2)

    print("KERNEL_OK")
</pallas_src>

<mosaic_0001>
module attributes {stable_mosaic.version = 11 : i64} {
  func.func @_chamfer_kernel(%arg0: i32, %arg1: i32, %arg2: i32, %arg3: memref<1x128x5xf32, #tpu.memory_space<vmem>>, %arg4: memref<1x5x128xf32, #tpu.memory_space<vmem>>, %arg5: memref<1x128x1xf32, #tpu.memory_space<vmem>>, %arg6: memref<1x2x128xf32, #tpu.memory_space<vmem>>) attributes {dimension_semantics = [#tpu.dimension_semantics<parallel>, #tpu.dimension_semantics<arbitrary>, #tpu.dimension_semantics<arbitrary>], iteration_bounds = array<i64: 2, 2, 2>, scalar_prefetch = 0 : i64, scratch_operands = 0 : i64, tpu.core_type = #tpu.core_type<tc>, window_params = [{transform_indices = @transform_0, window_bounds = array<i64: 1, 128, 5>}, {transform_indices = @transform_1, window_bounds = array<i64: 1, 5, 128>}, {transform_indices = @transform_2, window_bounds = array<i64: 1, 128, 1>}, {transform_indices = @transform_3, window_bounds = array<i64: 1, 2, 128>}]} {
    %c0 = arith.constant 0 : index
    %c0_0 = arith.constant 0 : index
    %c0_1 = arith.constant 0 : index
    %0 = vector.load %arg3[%c0, %c0_0, %c0_1] : memref<1x128x5xf32, #tpu.memory_space<vmem>>, vector<1x128x5xf32>
    %1 = vector.shape_cast %0 : vector<1x128x5xf32> to vector<128x5xf32>
    %c0_2 = arith.constant 0 : index
    %c0_3 = arith.constant 0 : index
    %c0_4 = arith.constant 0 : index
    %2 = vector.load %arg4[%c0_2, %c0_3, %c0_4] : memref<1x5x128xf32, #tpu.memory_space<vmem>>, vector<1x5x128xf32>
    %3 = vector.shape_cast %2 : vector<1x5x128xf32> to vector<5x128xf32>
    %cst = arith.constant dense<0.000000e+00> : vector<128x128xf32>
    %4 = tpu.matmul %1, %3, %cst {dimension_numbers = #tpu.dot_dimension_numbers<[1], [0], [0], [1], [0, 0, 1, 1], [], []>} : vector<128x5xf32>, vector<5x128xf32>, vector<128x128xf32> -> vector<128x128xf32>
    %cst_5 = arith.constant dense<0x7F800000> : vector<128xf32>
    %5 = vector.multi_reduction <minimumf>, %4, %cst_5 [1] : vector<128x128xf32> to vector<128xf32>
    %6 = vector.shape_cast %5 : vector<128xf32> to vector<128x1xf32>
    %cst_6 = arith.constant dense<0x7F800000> : vector<128xf32>
    %7 = vector.multi_reduction <minimumf>, %4, %cst_6 [0] : vector<128x128xf32> to vector<128xf32>
    %8 = vector.shape_cast %7 : vector<128xf32> to vector<1x128xf32>
    %c0_i32 = arith.constant 0 : i32
    %9 = arith.cmpi eq, %arg2, %c0_i32 : i32
    %10 = arith.extui %9 : i1 to i32
    %c0_i32_7 = arith.constant 0 : i32
    %11 = arith.cmpi ne, %10, %c0_i32_7 : i32
    scf.if %11 {
      %21 = vector.shape_cast %6 : vector<128x1xf32> to vector<1x128x1xf32>
      %c0_14 = arith.constant 0 : index
      %c0_15 = arith.constant 0 : index
      %c0_16 = arith.constant 0 : index
      %22 = vector.load %arg5[%c0_14, %c0_15, %c0_16] : memref<1x128x1xf32, #tpu.memory_space<vmem>>, vector<1x128x1xf32>
      tpu.vector_store %arg5[%c0_14, %c0_15, %c0_16], %21 {strides = array<i32>} : memref<1x128x1xf32, #tpu.memory_space<vmem>>, vector<1x128x1xf32>,
    } else {
    }
    %c0_i32_8 = arith.constant 0 : i32
    %12 = arith.cmpi sgt, %arg2, %c0_i32_8 : i32
    %13 = arith.extui %12 : i1 to i32
    %c0_i32_9 = arith.constant 0 : i32
    %14 = arith.cmpi ne, %13, %c0_i32_9 : i32
    scf.if %14 {
      %c0_14 = arith.constant 0 : index
      %c0_15 = arith.constant 0 : index
      %c0_16 = arith.constant 0 : index
      %21 = vector.load %arg5[%c0_14, %c0_15, %c0_16] : memref<1x128x1xf32, #tpu.memory_space<vmem>>, vector<1x128x1xf32>
      %22 = vector.shape_cast %6 : vector<128x1xf32> to vector<1x128x1xf32>
      %23 = arith.minimumf %21, %22 : vector<1x128x1xf32>
      %c0_17 = arith.constant 0 : index
      %c0_18 = arith.constant 0 : index
      %c0_19 = arith.constant 0 : index
      %24 = vector.load %arg5[%c0_17, %c0_18, %c0_19] : memref<1x128x1xf32, #tpu.memory_space<vmem>>, vector<1x128x1xf32>
      tpu.vector_store %arg5[%c0_17, %c0_18, %c0_19], %23 {strides = array<i32>} : memref<1x128x1xf32, #tpu.memory_space<vmem>>, vector<1x128x1xf32>,
    } else {
    }
    %c0_i32_10 = arith.constant 0 : i32
    %15 = arith.cmpi eq, %arg1, %c0_i32_10 : i32
    %16 = arith.extui %15 : i1 to i32
    %c0_i32_11 = arith.constant 0 : i32
    %17 = arith.cmpi ne, %16, %c0_i32_11 : i32
    scf.if %17 {
      %21 = vector.shape_cast %8 : vector<1x128xf32> to vector<1x1x128xf32>
      %c0_14 = arith.constant 0 : index
      %22 = arith.index_cast %arg2 : i32 to index
      %c0_15 = arith.constant 0 : index
      %23 = vector.load %arg6[%c0_14, %22, %c0_15] : memref<1x2x128xf32, #tpu.memory_space<vmem>>, vector<1x1x128xf32>
      tpu.vector_store %arg6[%c0_14, %22, %c0_15], %21 {strides = array<i32>} : memref<1x2x128xf32, #tpu.memory_space<vmem>>, vector<1x1x128xf32>,
    } else {
    }
    %c0_i32_12 = arith.constant 0 : i32
    %18 = arith.cmpi sgt, %arg1, %c0_i32_12 : i32
    %19 = arith.extui %18 : i1 to i32
    %c0_i32_13 = arith.constant 0 : i32
    %20 = arith.cmpi ne, %19, %c0_i32_13 : i32
    scf.if %20 {
      %c0_14 = arith.constant 0 : index
      %21 = arith.index_cast %arg2 : i32 to index
      %c0_15 = arith.constant 0 : index
      %22 = vector.load %arg6[%c0_14, %21, %c0_15] : memref<1x2x128xf32, #tpu.memory_space<vmem>>, vector<1x1x128xf32>
      %23 = vector.shape_cast %8 : vector<1x128xf32> to vector<1x1x128xf32>
      %24 = arith.minimumf %22, %23 : vector<1x1x128xf32>
      %c0_16 = arith.constant 0 : index
      %25 = arith.index_cast %arg2 : i32 to index
      %c0_17 = arith.constant 0 : index
      %26 = vector.load %arg6[%c0_16, %25, %c0_17] : memref<1x2x128xf32, #tpu.memory_space<vmem>>, vector<1x1x128xf32>
      tpu.vector_store %arg6[%c0_16, %25, %c0_17], %24 {strides = array<i32>} : memref<1x2x128xf32, #tpu.memory_space<vmem>>, vector<1x1x128xf32>,
    } else {
    }
    return
  }
  func.func @transform_0(%arg0: i32, %arg1: i32, %arg2: i32) -> (i32, i32, i32) {
    %c0_i32 = arith.constant 0 : i32
    %c0_i32_0 = arith.constant 0 : i32
    return %arg0, %arg1, %c0_i32 : i32, i32, i32
  }
  func.func @transform_1(%arg0: i32, %arg1: i32, %arg2: i32) -> (i32, i32, i32) {
    %c0_i32 = arith.constant 0 : i32
    %c0_i32_0 = arith.constant 0 : i32
    return %arg0, %c0_i32, %arg2 : i32, i32, i32
  }
  func.func @transform_2(%arg0: i32, %arg1: i32, %arg2: i32) -> (i32, i32, i32) {
    %c0_i32 = arith.constant 0 : i32
    %c0_i32_0 = arith.constant 0 : i32
    return %arg0, %arg1, %c0_i32 : i32, i32, i32
  }
  func.func @transform_3(%arg0: i32, %arg1: i32, %arg2: i32) -> (i32, i32, i32) {
    %c0_i32 = arith.constant 0 : i32
    %c0_i32_0 = arith.constant 0 : i32
    %c0_i32_1 = arith.constant 0 : i32
    return %arg0, %c0_i32, %c0_i32_0 : i32, i32, i32
  }
}

</mosaic_0001>

<bundles_post_ra>
// kernel: tpu_custom_call.1
= control target key start
LH: loop header
LB: loop body
LE: loop exit
PB: predicated region body
PF: predicated region fallthrough
CT: control target
= control target key end

     0   :  { %9 = vsyncpa [#allocation3], 0  ;;  %s1414_s0 = inlined_call_operand.vmem [shape: f32[2,256,5], index: 0, kind: input, shape index: {}]   ;;  %s1415_s1 = inlined_call_operand.vmem [shape: f32[2,5,256], index: 1, kind: input, shape index: {}]   ;;  %s1416_s2 = inlined_call_operand.vmem [shape: f32[2,256,1], index: 2, kind: output, shape index: {0}]   ;;  %s1417_s3 = inlined_call_operand.hbm [shape: f32[2,2,128], index: 3, kind: output, shape index: {1}]  }
   0x1   :  { %11 = vsyncpa [#allocation3 + $0x1], 0  ;;  %s1085_s12 = smov 0   ;;  %s1087_s13 = smov 0  }
   0x2   :  { %s1089_s14 = smov 0   ;;  %s1091_s15 = smov 0  }
   0x3   :  { %s1093_s16 = smov 0   ;;  %s1095_s17 = smov 0  }
   0x4   :  { %s1097_s18 = smov 0   ;;  %s1099_s19 = smov 0  }
   0x5   :  { %s1101_s20 = smov 0   ;;  %s1103_s21 = smov 0  }
   0x6 LB: > { %s781_s22 = sadd.s32 4294967295, %s1062_s21   ;;  %s782_s23 = sadd.s32 4294967294, %s1062_s21   ;;  %s1062_s21 = sphi %s1103_s21, %s17_s21   ;;  %s1058_s20 = sphi %s1101_s20, %s1435_s20   ;;  %s1054_s19 = sphi %s1099_s19, %s1434_s19   ;;  %s1050_s18 = sphi %s1097_s18, %s1433_s18   ;;  %s1046_s17 = sphi %s1095_s17, %s1432_s17   ;;  %s1042_s16 = sphi %s1093_s16, %s1431_s16   ;;  %s1038_s15 = sphi %s1091_s15, %s1430_s15   ;;  %s1034_s14 = sphi %s1089_s14, %s1429_s14   ;;  %s1030_s13 = sphi %s1087_s13, %s1428_s13   ;;  %s1026_s12 = sphi %s1085_s12, %s1427_s12  }
   0x7   : > { %s29_s24 = sadd.s32 1, %s1050_s18  ;;  %s32_s25 = sadd.s32 1, %s1054_s19 }
   0x8   : > { %p30_p0 = scmp.ge.s32.totalorder %s29_s24, 2  ;;  %s36_s26 = sadd.s32 1, %s1058_s20 }
   0x9   : > { %p137_p1 = scmp.ne.s32.totalorder %s1034_s14, %s1030_s13  ;;  %p138_p2 = scmp.eq.s32.totalorder %s781_s22, 7 }
   0xa   : > { %s1437_s24 = smov (%p30_p0, %s29_s24), 0  ;;  %s1439_s25 = smov (!%p30_p0, %s32_s25), %s1054_s19 }
   0xb   : > { %p143_p3 = scmp.ne.s32.totalorder %s1030_s13, %s1026_s12  ;;  %p34_p4 = scmp.ge.s32.totalorder %s1439_s25, 2 }
   0xc   : > { %p144_p5 = scmp.eq.s32.totalorder %s782_s23, 7  ;;  %p1147_p6 = por %p138_p2, %p137_p1 }
   0xd   : > { %p785_p7 = scmp.ge.s32.totalorder %s1062_s21, 1  ;;  %s1441_s25 = smov (%p34_p4, %s1439_s25), 0 }
   0xe   : > { %1421 = sst [smem:[#allocation5_spill]] %s1441_s25  ;;  %s1443_s26 = smov (!%p34_p4, %s36_s26), %s1058_s20 }
   0xf   : > { %p1155_p8 = por %p144_p5, %p143_p3  ;;  %p186_p9 = scmp.lt.s32.totalorder %s1062_s21, 9 }
  0x10   : > { %p38_p10 = scmp.ge.s32.totalorder %s1443_s26, 2  ;;  %s127_s30 = sadd.s32 1, %s1034_s14 }
  0x11   : > { %p187_p11 = pnand %p785_p7, %p186_p9 }
  0x12   : > { %s1445_s26 = smov (%p38_p10, %s1443_s26), 0  ;;  %s1419_s5 = sand.u32 (!%p187_p11), 1, %s1030_s13   ;;  %vm276_vm0 = vcmask (!%p187_p11), 39936   ;;  %vm325_vm1 = vcmask (!%p187_p11), 1044480  }
  0x13   : > { %1423 = sst [smem:[#allocation6_spill]] %s1445_s26  ;;  %s124_s29 = ssub.s32 %s1058_s20, %s1445_s26 }
  0x14   : > { %p125_p12 = scmp.eq.s32.totalorder %s124_s29, 0  ;;  %190 = sbr.rel (%p187_p11) target bundleno = 479 (0x1df), region = 28 }
  0x15   : > { %s787_s6 = sshll.u32 (!%p187_p11), %s1042_s16, 4  ;;  %s1172_s7 = sshll.u32 (!%p187_p11), %s1419_s5, 1 }
  0x16   : > { %s1166_s4 = scalar_select %p125_p12, %s1034_s14, %s127_s30  }
  0x17   : > { %p232_p13 = scmp.lt.s32.totalorder (!%p187_p11), %s1046_s17, 1  ;;  %p234_p0 = scmp.lt.s32.totalorder (!%p187_p11), %s787_s6, 31 }
  0x18   : > { %p243_p1 = scmp.lt.s32.totalorder (!%p187_p11), %s1038_s15, 1  ;;  %p812_p2 = scmp.ne.s32.totalorder (!%p187_p11), %s1038_s15, 0 }
  0x1b   : > { %s233_s8 = scalar_select %p232_p13, %s1046_s17, 1 }
  0x1c   : > { %s1447_s6 = smov (!%p234_p0, %s787_s6), 31  ;;  %vm531_vm2 = vcmask (!%p812_p2), 7168  }
  0x1d   : > { %s788_s9 = sshll.u32 %s233_s8, 5  ;;  %s790_s22 = sshll.u32 %s233_s8, 1 }
  0x1e   : > { %s237_s10 = sadd.s32 %s788_s9, %s1447_s6 }
  0x1f   : > { %s789_s11 = sshll.u32 %s237_s10, 3 }
  0x20   : > { %s1180_s30 = scalar_lea.vmem %s1414_s0, %s789_s11  ;;  %s1185_s5 = scalar_lea.vmem %s1416_s2, %s789_s11 }
  0x21   : > { %s244_s6 = scalar_select %p243_p1, %s1038_s15, 1  ;;  %v259_v0 = vld [vmem:[%s1180_s30] sm:$0xff]  ;;  %v260_v3 = vld [vmem:[%s1180_s30 + $0x8] sm:$0xff]  ;;  %v261_v5 = vld [vmem:[%s1180_s30 + $0x10] sm:$0xff] }
  0x22   : > { %v267_v1 = vld [vmem:[%s1180_s30 + $0x40] sm:$0xff]  ;;  %839 = vmatprep.mubr.msk.f32.mxu0 %vm276_vm0, %v259_v0  ;;  %v268_v4 = vld [vmem:[%s1180_s30 + $0x48] sm:$0xff]  ;;  %v269_v6 = vld [vmem:[%s1180_s30 + $0x50] sm:$0xff]  ;;  %s1244_s11 = scalar_lea.vmem [#allocation2], %s1172_s7 }
  0x23   : > { %851 = vmatprep.mubr.msk.f32.mxu1 %vm276_vm0, %v267_v1  ;;  %s246_s8 = sadd.s32 %s790_s22, %s244_s6  ;;  %v262_v7 = vld [vmem:[%s1180_s30 + $0x18] sm:$0xff]  ;;  %v263_v9 = vld [vmem:[%s1180_s30 + $0x20] sm:$0xff]  ;;  %v264_v11 = vld [vmem:[%s1180_s30 + $0x28] sm:$0xff] }
  0x24   : > { %s791_s9 = sshll.u32 %s246_s8, 3  ;;  %v270_v8 = vld [vmem:[%s1180_s30 + $0x58] sm:$0xff]  ;;  %v271_v10 = vld [vmem:[%s1180_s30 + $0x60] sm:$0xff]  ;;  %v272_v12 = vld [vmem:[%s1180_s30 + $0x68] sm:$0xff] }
  0x25   : > { %s248_s10 = scalar_lea.vmem %s1415_s1, %s791_s9  ;;  %v265_v13 = vld [vmem:[%s1180_s30 + $0x30] sm:$0xff]  ;;  %v266_v15 = vld [vmem:[%s1180_s30 + $0x38] sm:$0xff] }
  0x26   : > { %v275_v2 = vld [vmem:[%s248_s10] sm:$0x1f]  ;;  %v273_v14 = vld [vmem:[%s1180_s30 + $0x70] sm:$0xff]  ;;  %v274_v16 = vld [vmem:[%s1180_s30 + $0x78] sm:$0xff] }
  0x27   : > { %837 = vmatprep.subr.msk.mxu0 %vm325_vm1, %v275_v2  ;;  %863 = vmatprep.subr.msk.mxu1 %vm325_vm1, %v275_v2 }
  0x28   : > { %838 = vmatpush3.msk.msra.mxu0 %vm325_vm1, %v275_v2  ;;  %864 = vmatpush3.msk.msra.mxu1 %vm325_vm1, %v275_v2 }
  0x29   : > { %840 = vmatmul.mubr.msk.f32.vlgmr.msra.gmra.mrb[0].mxu0 %vm276_vm0, %v260_v3  ;;  %852 = vmatmul.mubr.msk.f32.vlgmr.msra.gmra.mrb[0].mxu1 %vm276_vm0, %v268_v4 }
  0x2a   : > { %842 = vmatprep.mubr.msk.f32.mxu0 %vm276_vm0, %v261_v5  ;;  %854 = vmatprep.mubr.msk.f32.mxu1 %vm276_vm0, %v269_v6 }
  0x2d   : > { %843 = vmatmul.mubr.msk.f32.gmra.mrb[2].mxu0 %vm276_vm0, %v262_v7  ;;  %855 = vmatmul.mubr.msk.f32.gmra.mrb[2].mxu1 %vm276_vm0, %v270_v8 }
  0x2e   : > { %845 = vmatprep.mubr.msk.f32.mxu0 %vm276_vm0, %v263_v9  ;;  %857 = vmatprep.mubr.msk.f32.mxu1 %vm276_vm0, %v271_v10 }
  0x31   : > { %846 = vmatmul.mubr.msk.f32.gmra.mrb[4].mxu0 %vm276_vm0, %v264_v11  ;;  %858 = vmatmul.mubr.msk.f32.gmra.mrb[4].mxu1 %vm276_vm0, %v272_v12 }
  0x32   : > { %848 = vmatprep.mubr.msk.f32.mxu0 %vm276_vm0, %v265_v13  ;;  %860 = vmatprep.mubr.msk.f32.mxu1 %vm276_vm0, %v273_v14 }
  0x35   : > { %849 = vmatmul.mubr.msk.f32.gmra.mrb[6].mxu0 %vm276_vm0, %v266_v15  ;;  %861 = vmatmul.mubr.msk.f32.gmra.mrb[6].mxu1 %vm276_vm0, %v274_v16 }
  0xfc   : > { %v841_v17 = vpop.f32.mrb[0].mxu0  ;;  %v853_v18 = vpop.f32.mrb[0].mxu1 }
  0xfd   : > { %492 = vmin.xlane.f32.xlu1 %v853_v18  ;;  %v435_v19 = vpop.f32.mrb[1].mxu1  ;;  %476 = vmin.xlane.f32.xlu0 %v841_v17  ;;  %v395_v20 = vpop.f32.mrb[1].mxu0 }
 0x100   : > { %v844_v21 = vpop.f32.mrb[2].mxu0  ;;  %v856_v22 = vpop.f32.mrb[2].mxu1 }
 0x101   : > { %474 = vmin.xlane.f32.xlu0 %v395_v20  ;;  %480 = vmin.xlane.f32.xlu1 %v844_v21  ;;  %v405_v23 = vpop.f32.mrb[3].mxu0  ;;  %v445_v24 = vpop.f32.mrb[3].mxu1 }
 0x104   : > { %v847_v25 = vpop.f32.mrb[4].mxu0  ;;  %v859_v26 = vpop.f32.mrb[4].mxu1 }
 0x105   : > { %v507_v27 = vmin.f32 %v841_v17, %v847_v25  ;;  %490 = vmin.xlane.f32.xlu0 %v435_v19  ;;  %496 = vmin.xlane.f32.xlu1 %v856_v22  ;;  %v415_v28 = vpop.f32.mrb[5].mxu0  ;;  %v455_v29 = vpop.f32.mrb[5].mxu1 }
 0x106   : > { %v506_v30 = vmin.f32 %v395_v20, %v415_v28 }
 0x107   : > { %v511_v31 = vmin.f32 %v507_v27, %v853_v18 }
 0x108   : > { %v850_v32 = vpop.f32.mrb[6].mxu0  ;;  %v510_v33 = vmin.f32 %v506_v30, %v435_v19  ;;  %v862_v34 = vpop.f32.mrb[6].mxu1 }
 0x109   : > { %v509_v35 = vmin.f32 %v844_v21, %v850_v32  ;;  %v515_v36 = vmin.f32 %v511_v31, %v859_v26  ;;  %494 = vmin.xlane.f32.xlu0 %v445_v24  ;;  %478 = vmin.xlane.f32.xlu1 %v405_v23  ;;  %v425_v37 = vpop.f32.mrb[7].mxu0  ;;  %v465_v38 = vpop.f32.mrb[7].mxu1 }
 0x10a   : > { %v514_v39 = vmin.f32 %v510_v33, %v455_v29  ;;  %v508_v40 = vmin.f32 %v405_v23, %v425_v37 }
 0x10b   : > { %v513_v41 = vmin.f32 %v509_v35, %v856_v22 }
 0x10c   : > { %v518_v42 = vmin.f32 %v514_v39, %v515_v36  ;;  %v512_v43 = vmin.f32 %v508_v40, %v445_v24 }
 0x10d   : > { %v517_v44 = vmin.f32 %v513_v41, %v862_v34  ;;  %484 = vmin.xlane.f32.xlu1 %v847_v25  ;;  %482 = vmin.xlane.f32.xlu0 %v415_v28 }
 0x10e   : > { %v516_v45 = vmin.f32 %v512_v43, %v465_v38 }
 0x110   : > { %v519_v46 = vmin.f32 %v516_v45, %v517_v44 }
 0x111   : > { %500 = vmin.xlane.f32.xlu1 %v859_v26  ;;  %498 = vmin.xlane.f32.xlu0 %v455_v29 }
 0x112   : > { %v520_v47 = vmin.f32 %v518_v42, %v519_v46 }
 0x114   : > { %v521_v48 = vrot.slane %v520_v47, 4 }
 0x115   : > { %488 = vmin.xlane.f32.xlu1 %v850_v32  ;;  %486 = vmin.xlane.f32.xlu0 %v425_v37 }
 0x116   : > { %v522_v49 = vmin.f32 %v520_v47, %v521_v48 }
 0x118   : > { %v523_v50 = vrot.slane %v522_v49, 2 }
 0x119   : > { %504 = vmin.xlane.f32.xlu1 %v862_v34  ;;  %502 = vmin.xlane.f32.xlu0 %v465_v38 }
 0x11a   : > { %v524_v51 = vmin.f32 %v522_v49, %v523_v50 }
 0x11c   : > { %v525_v52 = vrot.slane %v524_v51, 1 }
 0x11e   : > { %v1223_v53 = vmin.f32 %v524_v51, %v525_v52 }
 0x18a   : > { %v1225_v54 = vpop.xlane.xlu1 %492  ;;  %v477_v55 = vpop.xlane.xlu0 %476 }
 0x18b   : > { %533 = vst.msk [vmem:[%s1185_s5 + $0x8] sm:$0xff] (!%p812_p2), %vm531_vm2, %v477_v55  ;;  %541 = vst.msk [vmem:[%s1185_s5 + $0x48] sm:$0xff] (!%p812_p2), %vm531_vm2, %v1225_v54 }
 0x18e   : > { %v475_v56 = vpop.xlane.xlu0 %474  ;;  %v481_v57 = vpop.xlane.xlu1 %480 }
 0x18f   : > { %532 = vst.msk [vmem:[%s1185_s5] sm:$0xff] (!%p812_p2), %vm531_vm2, %v475_v56  ;;  %535 = vst.msk [vmem:[%s1185_s5 + $0x18] sm:$0xff] (!%p812_p2), %vm531_vm2, %v481_v57 }
 0x192   : > { %v1227_v58 = vpop.xlane.xlu0 %490  ;;  %v1229_v59 = vpop.xlane.xlu1 %496 }
 0x193   : > { %540 = vst.msk [vmem:[%s1185_s5 + $0x40] sm:$0xff] (!%p812_p2), %vm531_vm2, %v1227_v58  ;;  %543 = vst.msk [vmem:[%s1185_s5 + $0x58] sm:$0xff] (!%p812_p2), %vm531_vm2, %v1229_v59 }
 0x196   : > { %v1231_v60 = vpop.xlane.xlu0 %494  ;;  %v479_v61 = vpop.xlane.xlu1 %478 }
 0x197   : > { %534 = vst.msk [vmem:[%s1185_s5 + $0x10] sm:$0xff] (!%p812_p2), %vm531_vm2, %v479_v61  ;;  %542 = vst.msk [vmem:[%s1185_s5 + $0x50] sm:$0xff] (!%p812_p2), %vm531_vm2, %v1231_v60 }
 0x19a   : > { %v485_v62 = vpop.xlane.xlu1 %484  ;;  %v483_v63 = vpop.xlane.xlu0 %482 }
 0x19b   : > { %536 = vst.msk [vmem:[%s1185_s5 + $0x20] sm:$0xff] (!%p812_p2), %vm531_vm2, %v483_v63  ;;  %537 = vst.msk [vmem:[%s1185_s5 + $0x28] sm:$0xff] (!%p812_p2), %vm531_vm2, %v485_v62 }
 0x19e   : > { %v1233_v0 = vpop.xlane.xlu1 %500  ;;  %v1235_v1 = vpop.xlane.xlu0 %498 }
 0x19f   : > { %544 = vst.msk [vmem:[%s1185_s5 + $0x60] sm:$0xff] (!%p812_p2), %vm531_vm2, %v1235_v1  ;;  %545 = vst.msk [vmem:[%s1185_s5 + $0x68] sm:$0xff] (!%p812_p2), %vm531_vm2, %v1233_v0 }
 0x1a0   : > { %530 = sbr.rel (%p812_p2) target bundleno = 424 (0x1a8), region = 32 }
 0x1a2   : > { %v1237_v2 = vpop.xlane.xlu1 %488  ;;  %v487_v3 = vpop.xlane.xlu0 %486 }
 0x1a3   : > { %538 = vst.msk [vmem:[%s1185_s5 + $0x30] sm:$0xff] (!%p812_p2), %vm531_vm2, %v487_v3  ;;  %539 = vst.msk [vmem:[%s1185_s5 + $0x38] sm:$0xff] (!%p812_p2), %vm531_vm2, %v1237_v2 }
 0x1a6   : > { %v1239_v4 = vpop.xlane.xlu1 %504  ;;  %v1241_v5 = vpop.xlane.xlu0 %502 }
 0x1a7   : > { %546 = vst.msk [vmem:[%s1185_s5 + $0x70] sm:$0xff] %vm531_vm2, %v1241_v5  ;;  %547 = vst.msk [vmem:[%s1185_s5 + $0x78] sm:$0xff] %vm531_vm2, %v1239_v4 }
 0x1a8 PF: > { %p813_p3 = scmp.le.s32.totalorder %s1038_s15, 0 }
 0x1a9   : > { %v552_v6 = vld [vmem:[%s1185_s5] sm:$0xff] (!%p813_p3)  ;;  %vm584_vm3 = vcmask (!%p813_p3), 7168   ;;  %v553_v7 = vld [vmem:[%s1185_s5 + $0x8] sm:$0xff] (!%p813_p3)  ;;  %v554_v8 = vld [vmem:[%s1185_s5 + $0x10] sm:$0xff] (!%p813_p3) }
 0x1aa   : > { %551 = sbr.rel (%p813_p3) target bundleno = 436 (0x1b4), region = 36  ;;  %v568_v9 = vmin.f32 (!%p813_p3), %v552_v6, %v475_v56  ;;  %v569_v10 = vmin.f32 (!%p813_p3), %v553_v7, %v477_v55  ;;  %v570_v11 = vmin.f32 (!%p813_p3), %v554_v8, %v479_v61  ;;  %v555_v12 = vld [vmem:[%s1185_s5 + $0x18] sm:$0xff] (!%p813_p3)  ;;  %v556_v13 = vld [vmem:[%s1185_s5 + $0x20] sm:$0xff] (!%p813_p3)  ;;  %v557_v14 = vld [vmem:[%s1185_s5 + $0x28] sm:$0xff] (!%p813_p3) }
 0x1ab   : > { %v571_v15 = vmin.f32 (!%p813_p3), %v555_v12, %v481_v57  ;;  %v572_v16 = vmin.f32 (!%p813_p3), %v556_v13, %v483_v63  ;;  %v573_v17 = vmin.f32 (!%p813_p3), %v557_v14, %v485_v62  ;;  %v558_v18 = vld [vmem:[%s1185_s5 + $0x30] sm:$0xff] (!%p813_p3)  ;;  %v559_v19 = vld [vmem:[%s1185_s5 + $0x38] sm:$0xff] (!%p813_p3)  ;;  %v560_v20 = vld [vmem:[%s1185_s5 + $0x40] sm:$0xff] (!%p813_p3) }
 0x1ac   : > { %585 = vst.msk [vmem:[%s1185_s5] sm:$0xff] (!%p813_p3), %vm584_vm3, %v568_v9  ;;  %586 = vst.msk [vmem:[%s1185_s5 + $0x8] sm:$0xff] (!%p813_p3), %vm584_vm3, %v569_v10  ;;  %v574_v21 = vmin.f32 (!%p813_p3), %v558_v18, %v487_v3  ;;  %v575_v22 = vmin.f32 (!%p813_p3), %v559_v19, %v1237_v2  ;;  %v576_v23 = vmin.f32 (!%p813_p3), %v560_v20, %v1227_v58  ;;  %v561_v24 = vld [vmem:[%s1185_s5 + $0x48] sm:$0xff] (!%p813_p3)  ;;  %v562_v25 = vld [vmem:[%s1185_s5 + $0x50] sm:$0xff] (!%p813_p3) }
 0x1ad   : > { %587 = vst.msk [vmem:[%s1185_s5 + $0x10] sm:$0xff] (!%p813_p3), %vm584_vm3, %v570_v11  ;;  %v563_v26 = vld [vmem:[%s1185_s5 + $0x58] sm:$0xff] (!%p813_p3)  ;;  %588 = vst.msk [vmem:[%s1185_s5 + $0x18] sm:$0xff] (!%p813_p3), %vm584_vm3, %v571_v15  ;;  %v577_v27 = vmin.f32 (!%p813_p3), %v561_v24, %v1225_v54  ;;  %v578_v28 = vmin.f32 (!%p813_p3), %v562_v25, %v1231_v60  ;;  %v564_v30 = vld [vmem:[%s1185_s5 + $0x60] sm:$0xff] (!%p813_p3) }
 0x1ae   : > { %589 = vst.msk [vmem:[%s1185_s5 + $0x20] sm:$0xff] (!%p813_p3), %vm584_vm3, %v572_v16  ;;  %590 = vst.msk [vmem:[%s1185_s5 + $0x28] sm:$0xff] (!%p813_p3), %vm584_vm3, %v573_v17  ;;  %v579_v29 = vmin.f32 (!%p813_p3), %v563_v26, %v1229_v59  ;;  %v565_v31 = vld [vmem:[%s1185_s5 + $0x68] sm:$0xff] (!%p813_p3)  ;;  %v566_v32 = vld [vmem:[%s1185_s5 + $0x70] sm:$0xff] (!%p813_p3)  ;;  %v580_v33 = vmin.f32 (!%p813_p3), %v564_v30, %v1235_v1 }
 0x1af   : > { %591 = vst.msk [vmem:[%s1185_s5 + $0x30] sm:$0xff] (!%p813_p3), %vm584_vm3, %v574_v21  ;;  %592 = vst.msk [vmem:[%s1185_s5 + $0x38] sm:$0xff] (!%p813_p3), %vm584_vm3, %v575_v22  ;;  %v581_v34 = vmin.f32 (!%p813_p3), %v565_v31, %v1233_v0  ;;  %v582_v35 = vmin.f32 (!%p813_p3), %v566_v32, %v1241_v5  ;;  %v567_v36 = vld [vmem:[%s1185_s5 + $0x78] sm:$0xff] (!%p813_p3) }
 0x1b0   : > { %593 = vst.msk [vmem:[%s1185_s5 + $0x40] sm:$0xff] (!%p813_p3), %vm584_vm3, %v576_v23  ;;  %594 = vst.msk [vmem:[%s1185_s5 + $0x48] sm:$0xff] (!%p813_p3), %vm584_vm3, %v577_v27  ;;  %v583_v37 = vmin.f32 (!%p813_p3), %v567_v36, %v1239_v4 }
 0x1b1   : > { %595 = vst.msk [vmem:[%s1185_s5 + $0x50] sm:$0xff] %vm584_vm3, %v578_v28  ;;  %596 = vst.msk [vmem:[%s1185_s5 + $0x58] sm:$0xff] %vm584_vm3, %v579_v29 }
 0x1b2   : > { %597 = vst.msk [vmem:[%s1185_s5 + $0x60] sm:$0xff] %vm584_vm3, %v580_v33  ;;  %598 = vst.msk [vmem:[%s1185_s5 + $0x68] sm:$0xff] %vm584_vm3, %v581_v34 }
 0x1b3   : > { %599 = vst.msk [vmem:[%s1185_s5 + $0x70] sm:$0xff] %vm584_vm3, %v582_v35  ;;  %600 = vst.msk [vmem:[%s1185_s5 + $0x78] sm:$0xff] %vm584_vm3, %v583_v37 }
 0x1b4 PF: > { %p814_p4 = scmp.ne.s32.totalorder %s1042_s16, 0 }
 0x1b5   : > { %s605_s7 = scalar_lea.vmem (!%p814_p4), %s1244_s11, %s1038_s15 [#allocation2] }
 0x1b6   : > { %604 = sbr.rel (%p814_p4) target bundleno = 445 (0x1bd), region = 40  ;;  %606 = vst [vmem:[%s605_s7] sm:$0x1] (!%p814_p4), %v1223_v53 }
 0x1bd PF: > { %p815_p5 = scmp.le.s32.totalorder %s1042_s16, 0 }
 0x1be   : > { %s611_s22 = scalar_lea.vmem (!%p815_p5), %s1244_s11, %s1038_s15 [#allocation2] }
 0x1bf   : > { %610 = sbr.rel (%p815_p5) target bundleno = 454 (0x1c6), region = 44  ;;  %v612_v38 = vld [vmem:[%s611_s22] sm:$0x1] (!%p815_p5) }
 0x1c0   : > { %v613_v39 = vmin.f32 (!%p815_p5), %v612_v38, %v1223_v53 }
 0x1c2   : > { %614 = vst [vmem:[%s611_s22] sm:$0x1] (!%p815_p5), %v613_v39 }
 0x1c6 PF: > { %s817_s5 = sshll.u32 %s1046_s17, 5  ;;  %s642_s16 = sshll.u32 %s1244_s11, 4  ;;  %s643_s16 = int_to_ptr.vmem [resolvable:$true] %s642_s16 }
 0x1c7   : > { %s1358_s30 = scalar_lea.hbm %s1417_s3, %s817_s5  ;;  %s1424_s6 = sand.u32 1, %s1030_s13  }
 0x1c8   : > { %s625_s8 = scalar_lea.sflag [#allocation3], %s1424_s6  ;;  %s952_s15 = scalar_lea.vmem %s643_s16, 32 }
 0x1c9   : > { %p953_p7 = scmp.ne.s32.totalorder %s643_s16, %s952_s15  ;;  %s1064_s9 = smov [#allocation2]  }
 0x1ca   : > { %s956_s25 = sshll.u32 %s1064_s9, 4  ;;  %s957_s25 = int_to_ptr.vmem [resolvable:$false] %s956_s25 }
 0x1cb   : > { %p954_p9 = pnand %p953_p7, %p1147_p6  ;;  %s958_s26 = scalar_lea.vmem %s957_s25, 64 }
 0x1cc   : > { %p959_p11 = scmp.lt.s32.totalorder %s643_s16, %s957_s25  ;;  %p960_p12 = scmp.lt.s32.totalorder %s958_s26, %s952_s15 }
 0x1cd   : > { %p955_p10 = pneg %p954_p9 }
 0x1ce   : > { %p961_p13 = por %p960_p12, %p959_p11 }
 0x1d0   : > { %p962_p0 = pnand %p961_p13, %p955_p10 }
 0x1d2   : > { %965 = shalt.err (!%p962_p0)
}
 0x1d3   : > { %s966_s17 = scalar_lea.hbm %s1358_s30, 32  ;;  %s970_s7 = scalar_lea.hbm %s1417_s3, 64 }
 0x1d4   : > { %p967_p1 = scmp.ne.s32.totalorder %s1358_s30, %s966_s17  ;;  %p971_p4 = scmp.lt.u32.totalorder %s1358_s30, %s1417_s3 }
 0x1d5   : > { %p972_p5 = scmp.lt.u32.totalorder %s970_s7, %s966_s17  ;;  %p974_p9 = scmp.lt.u32.totalorder %s966_s17, %s1358_s30 }
 0x1d6   : > { %p968_p2 = pnand %p967_p1, %p1147_p6 }
 0x1d7   : > { %p973_p7 = por %p972_p5, %p971_p4 }
 0x1d8   : > { %p969_p3 = pneg %p968_p2 }
 0x1d9   : > { %p975_p10 = por %p974_p9, %p973_p7 }
 0x1db   : > { %p976_p11 = pnand %p975_p10, %p969_p3 }
 0x1dd   : > { %979 = shalt.err (!%p976_p11)
}
 0x1de   : > { %865 = dma.vmem_to_hbm [thread:$0]  (%p1147_p6), %s643_s16, 32, %s1358_s30, %s625_s8  }
 0x1df PF: > { %p871_p12 = scmp.ge.s32.totalorder %s1062_s21, 2  ;;  %s666_s23 = sand.u32 1, %s1026_s12  }
 0x1e0   : > { %s667_s29 = scalar_lea.sflag [#allocation3], %s666_s23 }
 0x1e1   : > { %p868_p13 = pnand %p871_p12, %p1155_p8 }
 0x1e3   : > { %1021 = dma.done.wait (!%p868_p13), %s667_s29, 32  }
 0x1e4   : > { %1023 = vsyncadd (!%p868_p13), %s667_s29, 4294967264  ;;  %s17_s21 = sadd.s32 1, %s1062_s21   ;;  %s1425_s27 = sld [smem:[#allocation5_spill]] }
 0x1e5   : > { %p14_p0 = scmp.ge.s32.totalorder %s17_s21, 10   ;;  %s1426_s30 = sld [smem:[#allocation6_spill]] }
 0x1e6   : > { %s1427_s12 = smov %s1030_s13  ;;  %s1428_s13 = smov %s1034_s14 }
 0x1e7   : > { %s1429_s14 = smov %s1166_s4  ;;  %s1430_s15 = smov %s1050_s18 }
 0x1e8   : > { %s1431_s16 = smov %s1054_s19  ;;  %s1432_s17 = smov %s1058_s20 }
 0x1e9   : > { %s1433_s18 = smov %s1437_s24  ;;  %16 = sbr.rel (!%p14_p0) target bundleno = 6 (0x6), region = 96 }
 0x1ea   : > { %s1434_s19 = smov %s1425_s27 }
 0x1eb   : > { %s1435_s20 = smov %s1426_s30 }
 0x1f0   :  { %672 = vsyncpa [#allocation3], 1 }
 0x1f1   :  { %674 = vsyncpa [#allocation3 + $0x1], 1 }

</bundles_post_ra>
